<compile_context>
chip_gen: v6e
topology: v6e:2x2x1
jax: 0.10.0
libtpu: 0.0.40
codegen_flags: <defaults>
</compile_context>

<pallas_src>
import functools

import jax
import jax.numpy as jnp
from jax.experimental import pallas as pl
from jax.experimental.pallas import tpu as pltpu

_BN_EPS = 1e-5
_TM = 256          # output-row tile (matches 2x256^2 MXU on v6e/v7x)
_TN = 256          # output-col tile
_TK_CHUNK = 512    # K chunk when K is too large for a single block
_K_SINGLE_MAX = 4096   # use a single full-K block (no pad, no K grid) below this
_VMEM_LIMIT = 32 * 1024 * 1024


def _rup(x, m):
    return ((x + m - 1) // m) * m


# ---------------------------------------------------------------------------
# Pallas kernels
# ---------------------------------------------------------------------------
def _gemm_kernel(*refs, relu, has_res):
    """bf16 GEMM with fused BN-bias (+residual) (+ReLU) epilogue.

    refs = (a, b, bias[, res], out, acc_scratch)
    """
    if has_res:
        a_ref, b_ref, bias_ref, res_ref, o_ref, acc_ref = refs
    else:
        a_ref, b_ref, bias_ref, o_ref, acc_ref = refs
        res_ref = None

    @pl.when(pl.program_id(2) == 0)
    def _():
        acc_ref[...] = jnp.zeros_like(acc_ref)

    acc_ref[...] += jnp.dot(a_ref[...], b_ref[...],
                            preferred_element_type=jnp.float32)

    @pl.when(pl.program_id(2) == pl.num_programs(2) - 1)
    def _():
        r = acc_ref[...] + bias_ref[...]              # (tm,tn) + (1,tn)
        if has_res:
            r = r + res_ref[...].astype(jnp.float32)
        if relu:
            r = jnp.maximum(r, 0.0)
        o_ref[...] = r.astype(o_ref.dtype)


def _pool_kernel(x_ref, o_ref):
    # (1, T*H*W, C) -> mean over the spatio-temporal axis (AdaptiveAvgPool3d(1))
    o_ref[...] = jnp.mean(x_ref[...].astype(jnp.float32), axis=1)


# ---------------------------------------------------------------------------
# GEMM wrapper (fused conv + BN(+res)(+ReLU) epilogue)
# ---------------------------------------------------------------------------
def fused_gemm(a, b, bias, residual=None, relu=True, out_dtype=jnp.bfloat16):
    """(M,K)bf16 @ (K,N)bf16 -> (M,N) with f32 accum, bias/res/ReLU epilogue."""
    M, K = a.shape
    Kb, N = b.shape
    assert K == Kb and bias.shape == (1, N)

    tm = min(_TM, _rup(M, 8))
    tn = min(_TN, _rup(N, 128))

    if _rup(K, 128) <= _K_SINGLE_MAX:
        # single full-K block: no K padding, epilogue runs on the only K step
        tk, gk = K, 1
        a_p, b_p = a, b
    else:
        tk = _TK_CHUNK
        kp = _rup(K, tk)
        gk = kp // tk
        # K must stay zero-padded on both operands for correct accumulation
        a_p = jnp.pad(a, ((0, 0), (0, kp - K)))
        b_p = jnp.pad(b, ((0, kp - K), (0, 0)))

    gm = pl.cdiv(M, tm)
    gn = pl.cdiv(N, tn)
    has_res = residual is not None

    in_specs = [
        pl.BlockSpec((tm, tk), lambda i, j, k: (i, k)),
        pl.BlockSpec((tk, tn), lambda i, j, k: (k, j)),
        pl.BlockSpec((1, tn), lambda i, j, k: (0, j)),
    ]
    operands = [a_p, b_p, bias]
    if has_res:
        in_specs.append(pl.BlockSpec((tm, tn), lambda i, j, k: (i, j)))
        operands.append(residual)

    kern = functools.partial(_gemm_kernel, relu=relu, has_res=has_res)
    return pl.pallas_call(
        kern,
        out_shape=jax.ShapeDtypeStruct((M, N), out_dtype),
        grid_spec=pltpu.PrefetchScalarGridSpec(
            num_scalar_prefetch=0,
            grid=(gm, gn, gk),
            in_specs=in_specs,
            out_specs=pl.BlockSpec((tm, tn), lambda i, j, k: (i, j)),
            scratch_shapes=[pltpu.VMEM((tm, tn), jnp.float32)],
        ),
        compiler_params=pltpu.CompilerParams(
            dimension_semantics=("parallel", "parallel", "arbitrary"),
            vmem_limit_bytes=_VMEM_LIMIT),
    )(*operands)


# ---------------------------------------------------------------------------
# Conv3d (+folded BN, optional fused residual/ReLU) via im2col + fused GEMM
# ---------------------------------------------------------------------------
def conv_bn(x, conv, ksize, stride, padding, relu=True, residual=None):
    """x: (N,T,H,W,Cin) bf16; conv: dict(w=(K,Cout) bf16 BN-folded, b=(1,Cout) f32)."""
    n, t, h, w, cin = x.shape
    kt, kh, kw = ksize
    st, sh, sw = stride
    pt, ph, pw = padding
    cout = conv["w"].shape[1]

    if (kt, kh, kw) == (1, 1, 1) and (pt, ph, pw) == (0, 0, 0):
        # 1x1x1 conv (downsample): no patch extraction needed
        xs = x[:, ::st, ::sh, ::sw, :]
        to, ho, wo = xs.shape[1:4]
        a = xs.reshape(-1, cin)
    else:
        xp = jnp.pad(x, ((0, 0), (pt, pt), (ph, ph), (pw, pw), (0, 0)))
        to = (t + 2 * pt - kt) // st + 1
        ho = (h + 2 * ph - kh) // sh + 1
        wo = (w + 2 * pw - kw) // sw + 1
        cols = []
        for dt in range(kt):
            for dh in range(kh):
                for dw in range(kw):
                    cols.append(xp[:, dt:dt + to * st:st,
                                   dh:dh + ho * sh:sh,
                                   dw:dw + wo * sw:sw, :])
        # (dt, dh, dw, cin) row ordering matches the prepared weight matrix
        a = jnp.concatenate(cols, axis=-1).reshape(
            n * to * ho * wo, kt * kh * kw * cin)

    res2d = None if residual is None else residual.reshape(-1, cout)
    out = fused_gemm(a, conv["w"], conv["b"], residual=res2d, relu=relu)
    return out.reshape(n, to, ho, wo, cout)


def global_avg_pool(x):
    n, t, h, w, c = x.shape
    thw = t * h * w
    return pl.pallas_call(
        _pool_kernel,
        out_shape=jax.ShapeDtypeStruct((n, c), jnp.float32),
        grid_spec=pltpu.PrefetchScalarGridSpec(
            num_scalar_prefetch=0,
            grid=(n,),
            in_specs=[pl.BlockSpec((1, thw, c), lambda i: (i, 0, 0))],
            out_specs=pl.BlockSpec((1, c), lambda i: (i, 0)),
        ),
        compiler_params=pltpu.CompilerParams(
            dimension_semantics=("parallel",),
            vmem_limit_bytes=_VMEM_LIMIT),
    )(x.reshape(n, thw, c))


# ---------------------------------------------------------------------------
# R(2+1)D-34 parameter init (deterministic, synthetic) + GEMM-layout prep
# ---------------------------------------------------------------------------
def _init_conv(key, cout, cin, kt, kh, kw):
    fan_in = cin * kt * kh * kw
    return (jax.random.normal(key, (cout, cin, kt, kh, kw), jnp.float32)
            * jnp.sqrt(2.0 / fan_in))


def _init_bn(key, c):
    k1, k2, k3, k4 = jax.random.split(key, 4)
    return dict(
        gamma=1.0 + 0.05 * jax.random.normal(k1, (c,), jnp.float32),
        beta=0.05 * jax.random.normal(k2, (c,), jnp.float32),
        mean=0.05 * jax.random.normal(k3, (c,), jnp.float32),
        var=jax.random.uniform(k4, (c,), jnp.float32, 0.8, 1.2),
    )


def _midplanes(inplanes, planes):
    return (inplanes * planes * 3 * 3 * 3) // (inplanes * 3 * 3 + 3 * planes)


def _init_c2p1d(key, inplanes, planes, mid):
    k1, k2, k3 = jax.random.split(key, 3)
    return dict(
        w_s=_init_conv(k1, mid, inplanes, 1, 3, 3),   # spatial (1,3,3)
        bn_mid=_init_bn(k2, mid),
        w_t=_init_conv(k3, planes, mid, 3, 1, 1),     # temporal (3,1,1)
    )


def _init_block(key, inplanes, planes, stride):
    mid = _midplanes(inplanes, planes)
    ks = jax.random.split(key, 6)
    p = dict(
        conv1=_init_c2p1d(ks[0], inplanes, planes, mid),
        bn1=_init_bn(ks[1], planes),
        conv2=_init_c2p1d(ks[2], planes, planes, mid),
        bn2=_init_bn(ks[3], planes),
        stride=stride,
    )
    if stride != 1 or inplanes != planes:
        p["down_w"] = _init_conv(ks[4], planes, inplanes, 1, 1, 1)
        p["down_bn"] = _init_bn(ks[5], planes)
    return p


def init_r2plus1d_34_params(key):
    ks = jax.random.split(key, 5)
    params = dict(
        stem=dict(
            w1=_init_conv(ks[0], 45, 3, 1, 7, 7),     # (1,7,7) s(1,2,2) p(0,3,3)
            bn1=_init_bn(ks[1], 45),
            w2=_init_conv(ks[2], 64, 45, 3, 1, 1),    # (3,1,1) s1 p(1,0,0)
            bn2=_init_bn(ks[3], 64),
        ),
        layers=[],
    )
    cfg = [(64, 3, 1), (128, 4, 2), (256, 6, 2), (512, 3, 2)]   # R(2+1)D-34
    inplanes = 64
    lkeys = jax.random.split(ks[4], len(cfg))
    for (planes, nblocks, stride), lk in zip(cfg, lkeys):
        bkeys = jax.random.split(lk, nblocks)
        blocks = []
        for bi in range(nblocks):
            s = stride if bi == 0 else 1
            blocks.append(_init_block(bkeys[bi], inplanes, planes, s))
            inplanes = planes
        params["layers"].append(blocks)
    return params


def _fold(w, bn):
    """Fold eval-mode BN into the conv: bf16 (K,Cout) weight + f32 (1,Cout) bias."""
    scale = bn["gamma"] * jax.lax.rsqrt(bn["var"] + _BN_EPS)       # (cout,)
    bias = bn["beta"] - bn["mean"] * scale                         # (cout,)
    cout = w.shape[0]
    wmat = jnp.transpose(w, (2, 3, 4, 1, 0)).reshape(-1, cout) * scale[None, :]
    return dict(w=wmat.astype(jnp.bfloat16),
                b=bias.reshape(1, cout).astype(jnp.float32))


def prepare_params(raw):
    """One-time prep: GEMM-layout, bf16, BN-folded weights (hot path stays clean)."""
    st = raw["stem"]
    prep = dict(stem1=_fold(st["w1"], st["bn1"]),
                stem2=_fold(st["w2"], st["bn2"]),
                layers=[])
    for blocks in raw["layers"]:
        pblocks = []
        for b in blocks:
            pb = dict(
                stride=b["stride"],
                c1s=_fold(b["conv1"]["w_s"], b["conv1"]["bn_mid"]),
                c1t=_fold(b["conv1"]["w_t"], b["bn1"]),
                c2s=_fold(b["conv2"]["w_s"], b["conv2"]["bn_mid"]),
                c2t=_fold(b["conv2"]["w_t"], b["bn2"]),
            )
            if "down_w" in b:
                pb["down"] = _fold(b["down_w"], b["down_bn"])
            pblocks.append(pb)
        prep["layers"].append(pblocks)
    return prep


# ---------------------------------------------------------------------------
# Forward pass  ==  custom(model).forward
# ---------------------------------------------------------------------------
def basic_block(x, p):
    stride = p["stride"]
    # residual branch first so it can be fused into conv2's GEMM epilogue
    if "down" in p:
        res = conv_bn(x, p["down"], (1, 1, 1), (stride, stride, stride),
                      (0, 0, 0), relu=False)
    else:
        res = x
    # conv1: spatial -> BN(mid)+ReLU fused; temporal -> BN1+ReLU fused
    out = conv_bn(x, p["c1s"], (1, 3, 3), (1, stride, stride), (0, 1, 1),
                  relu=True)
    out = conv_bn(out, p["c1t"], (3, 1, 1), (stride, 1, 1), (1, 0, 0),
                  relu=True)
    # conv2: spatial -> BN(mid)+ReLU fused; temporal -> BN2 + residual + ReLU fused
    out = conv_bn(out, p["c2s"], (1, 3, 3), (1, 1, 1), (0, 1, 1), relu=True)
    out = conv_bn(out, p["c2t"], (3, 1, 1), (1, 1, 1), (1, 0, 0), relu=True,
                  residual=res)
    return out


def custom_forward(x_ncdhw, prep):
    # PyTorch NCDHW -> channels-last (N, T, H, W, C), bf16 activations
    x = jnp.transpose(x_ncdhw, (0, 2, 3, 4, 1)).astype(jnp.bfloat16)

    x = conv_bn(x, prep["stem1"], (1, 7, 7), (1, 2, 2), (0, 3, 3), relu=True)
    x = conv_bn(x, prep["stem2"], (3, 1, 1), (1, 1, 1), (1, 0, 0), relu=True)

    for blocks in prep["layers"]:
        for bp in blocks:
            x = basic_block(x, bp)

    feat = global_avg_pool(x)          # == AdaptiveAvgPool3d((1,1,1))
    return feat.reshape(-1, 512)       # == x.view(-1, 512)


if __name__ == "__main__":
    key = jax.random.PRNGKey(0)
    pkey, xkey = jax.random.split(key)
    raw_params = init_r2plus1d_34_params(pkey)
    prep_params = prepare_params(raw_params)

    # Small video clip, PyTorch NCDHW convention: (N=2, C=3, T=8, H=32, W=32).
    x = jax.random.normal(xkey, (2, 3, 8, 32, 32), jnp.float32)

    out = custom_forward(x, prep_params)
    out = jax.block_until_ready(out)
    assert out.shape == (2, 512), out.shape
    assert bool(jnp.all(jnp.isfinite(out))), "non-finite output"
    print("KERNEL_OK")
</pallas_src>

<mosaic_0001>
module attributes {stable_mosaic.version = 11 : i64} {
  func.func @_gemm_kernel(%arg0: i32, %arg1: i32, %arg2: i32, %arg3: memref<256x147xbf16, #tpu.memory_space<vmem>>, %arg4: memref<147x128xbf16, #tpu.memory_space<vmem>>, %arg5: memref<1x128xf32, #tpu.memory_space<vmem>>, %arg6: memref<256x128xbf16, #tpu.memory_space<vmem>>, %arg7: memref<256x128xf32, #tpu.memory_space<vmem>>) attributes {dimension_semantics = [#tpu.dimension_semantics<parallel>, #tpu.dimension_semantics<parallel>, #tpu.dimension_semantics<arbitrary>], iteration_bounds = array<i64: 16, 1, 1>, scalar_prefetch = 0 : i64, scratch_operands = 1 : i64, tpu.core_type = #tpu.core_type<tc>, window_params = [{transform_indices = @transform_0, window_bounds = array<i64: 256, 147>}, {transform_indices = @transform_1, window_bounds = array<i64: 147, 128>}, {transform_indices = @transform_2, window_bounds = array<i64: 1, 128>}, {transform_indices = @transform_3, window_bounds = array<i64: 256, 128>}]} {
    %c0_i32 = arith.constant 0 : i32
    %0 = arith.cmpi eq, %arg2, %c0_i32 : i32
    %1 = arith.extui %0 : i1 to i32
    %c0_i32_0 = arith.constant 0 : i32
    %2 = arith.cmpi ne, %1, %c0_i32_0 : i32
    scf.if %2 {
      %cst_10 = arith.constant 0.000000e+00 : f32
      %12 = vector.broadcast %cst_10 : f32 to vector<256x128xf32>
      %c0_11 = arith.constant 0 : index
      %c0_12 = arith.constant 0 : index
      %13 = vector.load %arg7[%c0_11, %c0_12] : memref<256x128xf32, #tpu.memory_space<vmem>>, vector<256x128xf32>
      tpu.vector_store %arg7[%c0_11, %c0_12], %12 {strides = array<i32>} : memref<256x128xf32, #tpu.memory_space<vmem>>, vector<256x128xf32>,
    } else {
    }
    %c0 = arith.constant 0 : index
    %c0_1 = arith.constant 0 : index
    %3 = vector.load %arg7[%c0, %c0_1] : memref<256x128xf32, #tpu.memory_space<vmem>>, vector<256x128xf32>
    %c0_2 = arith.constant 0 : index
    %c0_3 = arith.constant 0 : index
    %4 = vector.load %arg3[%c0_2, %c0_3] : memref<256x147xbf16, #tpu.memory_space<vmem>>, vector<256x147xbf16>
    %c0_4 = arith.constant 0 : index
    %c0_5 = arith.constant 0 : index
    %5 = vector.load %arg4[%c0_4, %c0_5] : memref<147x128xbf16, #tpu.memory_space<vmem>>, vector<147x128xbf16>
    %cst = arith.constant dense<0.000000e+00> : vector<256x128xf32>
    %6 = tpu.matmul %4, %5, %cst {dimension_numbers = #tpu.dot_dimension_numbers<[1], [0], [0], [1], [0, 0, 1, 1], [], []>} : vector<256x147xbf16>, vector<147x128xbf16>, vector<256x128xf32> -> vector<256x128xf32>
    %7 = arith.addf %3, %6 : vector<256x128xf32>
    %c0_6 = arith.constant 0 : index
    %c0_7 = arith.constant 0 : index
    %8 = vector.load %arg7[%c0_6, %c0_7] : memref<256x128xf32, #tpu.memory_space<vmem>>, vector<256x128xf32>
    tpu.vector_store %arg7[%c0_6, %c0_7], %7 {strides = array<i32>} : memref<256x128xf32, #tpu.memory_space<vmem>>, vector<256x128xf32>,
    %c0_i32_8 = arith.constant 0 : i32
    %9 = arith.cmpi eq, %arg2, %c0_i32_8 : i32
    %10 = arith.extui %9 : i1 to i32
    %c0_i32_9 = arith.constant 0 : i32
    %11 = arith.cmpi ne, %10, %c0_i32_9 : i32
    scf.if %11 {
      %c0_10 = arith.constant 0 : index
      %c0_11 = arith.constant 0 : index
      %12 = vector.load %arg7[%c0_10, %c0_11] : memref<256x128xf32, #tpu.memory_space<vmem>>, vector<256x128xf32>
      %c0_12 = arith.constant 0 : index
      %c0_13 = arith.constant 0 : index
      %13 = vector.load %arg5[%c0_12, %c0_13] : memref<1x128xf32, #tpu.memory_space<vmem>>, vector<1x128xf32>
      %14 = vector.broadcast %13 : vector<1x128xf32> to vector<256x128xf32>
      %15 = arith.addf %12, %14 : vector<256x128xf32>
      %cst_14 = arith.constant 0.000000e+00 : f32
      %16 = vector.broadcast %cst_14 : f32 to vector<256x128xf32>
      %17 = arith.maximumf %15, %16 : vector<256x128xf32>
      %18 = arith.truncf %17 : vector<256x128xf32> to vector<256x128xbf16>
      %c0_15 = arith.constant 0 : index
      %c0_16 = arith.constant 0 : index
      %19 = vector.load %arg6[%c0_15, %c0_16] : memref<256x128xbf16, #tpu.memory_space<vmem>>, vector<256x128xbf16>
      tpu.vector_store %arg6[%c0_15, %c0_16], %18 {strides = array<i32>} : memref<256x128xbf16, #tpu.memory_space<vmem>>, vector<256x128xbf16>,
    } else {
    }
    return
  }
  func.func @transform_0(%arg0: i32, %arg1: i32, %arg2: i32) -> (i32, i32) {
    %c0_i32 = arith.constant 0 : i32
    return %arg0, %arg2 : i32, i32
  }
  func.func @transform_1(%arg0: i32, %arg1: i32, %arg2: i32) -> (i32, i32) {
    %c0_i32 = arith.constant 0 : i32
    return %arg2, %arg1 : i32, i32
  }
  func.func @transform_2(%arg0: i32, %arg1: i32, %arg2: i32) -> (i32, i32) {
    %c0_i32 = arith.constant 0 : i32
    %c0_i32_0 = arith.constant 0 : i32
    return %c0_i32, %arg1 : i32, i32
  }
  func.func @transform_3(%arg0: i32, %arg1: i32, %arg2: i32) -> (i32, i32) {
    %c0_i32 = arith.constant 0 : i32
    return %arg0, %arg1 : i32, i32
  }
}

</mosaic_0001>

<bundles_post_ra>
// kernel: tpu_custom_call.1
= control target key start
LH: loop header
LB: loop body
LE: loop exit
PB: predicated region body
PF: predicated region fallthrough
CT: control target
= control target key end

     0   :  { %s1632_s12 = smov 0   ;;  %s1634_s13 = smov 0   ;;  %s1804_s0 = inlined_call_operand.vmem [shape: bf16[4096,147], index: 0, kind: input, shape index: {}]   ;;  %s1805_s1 = inlined_call_operand.vmem [shape: bf16[147,45], index: 1, kind: input, shape index: {}]   ;;  %s1806_s2 = inlined_call_operand.vmem [shape: f32[1,45], index: 2, kind: input, shape index: {}]   ;;  %s1807_s3 = inlined_call_operand.vmem [shape: bf16[4096,45], index: 3, kind: output, shape index: {}]  }
   0x1   :  { %s1636_s14 = smov 0  }
   0x2 LB: > { %s32_s15 = sadd.s32 1, %s1604_s13  ;;  %p1255_p0 = scmp.ge.s32.totalorder %s1608_s14, 1  ;;  %s1608_s14 = sphi %s1636_s14, %s13_s14   ;;  %s1604_s13 = sphi %s1634_s13, %s1809_s13   ;;  %s1600_s12 = sphi %s1632_s12, %s1808_s12  }
   0x3   : > { %p34_p1 = scmp.ge.s32.totalorder %s32_s15, 16  ;;  %p191_p2 = scmp.lt.s32.totalorder %s1608_s14, 17 }
   0x5   : > { %s1811_s15 = smov (%p34_p1, %s32_s15), 0  ;;  %p192_p3 = pnand %p1255_p0, %p191_p2 }
   0x6   : > { %s1256_s22 = sshll.u32 (!%p192_p3), %s1600_s12, 5 }
   0x7   : > { %195 = sbr.rel (%p192_p3) target bundleno = 313 (0x139), region = 32  ;;  %p236_p4 = scmp.lt.s32.totalorder (!%p192_p3), %s1256_s22, 511 }
   0xc   : > { %v1528_v0 = vld [vmem:[%s1805_s1 + $0x38] sm:$0xff]   ;;  %v1610_v1 = vmov 0   ;;  %v1529_v2 = vld [vmem:[%s1805_s1 + $0x30] sm:$0xff]   ;;  %v1530_v3 = vld [vmem:[%s1805_s1 + $0x28] sm:$0xff]   ;;  %s1813_s22 = smov (!%p236_p4, %s1256_s22), 511  ;;  %vm588_vm0 = vcmask 154624  }
   0xd   : > { %644 = vmatprep.subr.bf16.mxu0 %v1610_v1  ;;  %1482 = vmatprep.subr.bf16.mxu1 %v1610_v1  ;;  %v1531_v4 = vld [vmem:[%s1805_s1 + $0x20] sm:$0xff]   ;;  %s1354_s25 = sshll.u32 %s1813_s22, 3  ;;  %v1532_v5 = vld [vmem:[%s1805_s1 + $0x18] sm:$0xff]   ;;  %v1533_v8 = vld [vmem:[%s1805_s1 + $0x10] sm:$0xff]   ;;  %vm637_vm1 = vcmask 1040384   ;;  %vm638_vm2 = vcmask 1041408  }
   0xe   : > { %645 = vmatpush1.bf16.msra.mxu0 %v1528_v0  ;;  %1492 = vmatpush1.bf16.msra.mxu1 %v1528_v0  ;;  %s1668_s28 = scalar_lea.vmem %s1804_s0, %s1354_s25  ;;  %v1534_v9 = vld [vmem:[%s1805_s1 + $0x8] sm:$0xff]   ;;  %v1611_v10 = vmov 65535   ;;  %v1535_v12 = vld [vmem:[%s1805_s1] sm:$0xff]   ;;  %s1260_s19 = sshll.u32 %s1813_s22, 2 }
   0xf   : > { %646 = vmatprep.subr.bf16.mxu0 %v1610_v1  ;;  %1483 = vmatprep.subr.bf16.mxu1 %v1610_v1  ;;  %v1540_v6 = vld [vmem:[%s1668_s28 + $0x4] ss:$8 sps:$4 sm:$0xff]   ;;  %v639_v11 = vsel %vm637_vm1, 4294967295, %v1611_v10  ;;  %v1536_v13 = vld [vmem:[%s1805_s1 + $0x48] ss:$0 sps:$4 sm:$0x33]   ;;  %s1749_s23 = scalar_lea.vmem %s1807_s3, %s1260_s19 }
  0x10   : > { %v1543_v7 = vld [vmem:[%s1668_s28 + $0x84] ss:$8 sps:$4 sm:$0xff]   ;;  %1303 = vmatprep.mubr.msk.bf16.mxu0 %vm588_vm0, %v1540_v6  ;;  %v640_v14 = vsel %vm638_vm2, %v639_v11, 0  ;;  %v1538_v17 = vld [vmem:[%s1668_s28] ss:$8 sps:$4 sm:$0xff]  }
  0x11   : > { %1311 = vmatprep.mubr.msk.bf16.mxu1 %vm588_vm0, %v1543_v7  ;;  %v642_v15 = vand.u32 %v1536_v13, %v640_v14  ;;  %v1537_v16 = vld [vmem:[%s1805_s1 + $0x40] sm:$0xff]   ;;  %v1544_v19 = vld [vmem:[%s1668_s28 + $0x14] ss:$8 sps:$4 sm:$0xff]   ;;  %v1548_v21 = vld [vmem:[%s1668_s28 + $0x10] ss:$8 sps:$4 sm:$0xff]  }
  0x12   : > { %647 = vmatpush1.bf16.msra.mxu0 %v1529_v2  ;;  %1493 = vmatpush1.bf16.msra.mxu1 %v1529_v2  ;;  %v1541_v18 = vld [vmem:[%s1668_s28 + $0x80] ss:$8 sps:$4 sm:$0xff]   ;;  %v1546_v20 = vld [vmem:[%s1668_s28 + $0x94] ss:$8 sps:$4 sm:$0xff]   ;;  %v1549_v22 = vld [vmem:[%s1668_s28 + $0x90] ss:$8 sps:$4 sm:$0xff]  }
  0x13   : > { %648 = vmatprep.subr.bf16.mxu0 %v1610_v1  ;;  %1484 = vmatprep.subr.bf16.mxu1 %v1610_v1  ;;  %v1550_v23 = vld [vmem:[%s1668_s28 + $0x24] ss:$8 sps:$4 sm:$0xff]   ;;  %v1554_v25 = vld [vmem:[%s1668_s28 + $0x20] ss:$8 sps:$4 sm:$0xff]   ;;  %v1556_v27 = vld [vmem:[%s1668_s28 + $0x34] ss:$8 sps:$4 sm:$0xff]  }
  0x14   : > { %v1552_v24 = vld [vmem:[%s1668_s28 + $0xa4] ss:$8 sps:$4 sm:$0xff]   ;;  %v1555_v26 = vld [vmem:[%s1668_s28 + $0xa0] ss:$8 sps:$4 sm:$0xff]   ;;  %v1558_v28 = vld [vmem:[%s1668_s28 + $0xb4] ss:$8 sps:$4 sm:$0xff]  }
  0x15   : > { %v1560_v29 = vld [vmem:[%s1668_s28 + $0x30] ss:$8 sps:$4 sm:$0xff]   ;;  %v1562_v31 = vld [vmem:[%s1668_s28 + $0x44] ss:$8 sps:$4 sm:$0xff]   ;;  %v1566_v33 = vld [vmem:[%s1668_s28 + $0x40] ss:$8 sps:$4 sm:$0xff]  }
  0x16   : > { %649 = vmatpush1.bf16.msra.mxu0 %v1530_v3  ;;  %1494 = vmatpush1.bf16.msra.mxu1 %v1530_v3  ;;  %v1561_v30 = vld [vmem:[%s1668_s28 + $0xb0] ss:$8 sps:$4 sm:$0xff]   ;;  %v1564_v32 = vld [vmem:[%s1668_s28 + $0xc4] ss:$8 sps:$4 sm:$0xff]   ;;  %v1567_v34 = vld [vmem:[%s1668_s28 + $0xc0] ss:$8 sps:$4 sm:$0xff]  }
  0x17   : > { %650 = vmatprep.subr.bf16.mxu0 %v1610_v1  ;;  %1485 = vmatprep.subr.bf16.mxu1 %v1610_v1  ;;  %v1568_v35 = vld [vmem:[%s1668_s28 + $0x54] ss:$8 sps:$4 sm:$0xff]   ;;  %v1572_v37 = vld [vmem:[%s1668_s28 + $0x50] ss:$8 sps:$4 sm:$0xff]   ;;  %v1574_v39 = vld [vmem:[%s1668_s28 + $0x64] ss:$8 sps:$4 sm:$0xff]  }
  0x18   : > { %v1570_v36 = vld [vmem:[%s1668_s28 + $0xd4] ss:$8 sps:$4 sm:$0xff]   ;;  %v1573_v38 = vld [vmem:[%s1668_s28 + $0xd0] ss:$8 sps:$4 sm:$0xff]   ;;  %v1576_v40 = vld [vmem:[%s1668_s28 + $0xe4] ss:$8 sps:$4 sm:$0xff]  }
  0x19   : > { %v1578_v41 = vld [vmem:[%s1668_s28 + $0x60] ss:$8 sps:$4 sm:$0xff]   ;;  %v1580_v43 = vld [vmem:[%s1668_s28 + $0x74] ss:$8 sps:$4 sm:$0xff]   ;;  %v1584_v45 = vld [vmem:[%s1668_s28 + $0x70] ss:$8 sps:$4 sm:$0xff]  }
  0x1a   : > { %651 = vmatpush1.bf16.msra.mxu0 %v1531_v4  ;;  %1495 = vmatpush1.bf16.msra.mxu1 %v1531_v4  ;;  %v1579_v42 = vld [vmem:[%s1668_s28 + $0xe0] ss:$8 sps:$4 sm:$0xff]   ;;  %v1582_v44 = vld [vmem:[%s1668_s28 + $0xf4] ss:$8 sps:$4 sm:$0xff]   ;;  %v1585_v46 = vld [vmem:[%s1668_s28 + $0xf0] ss:$8 sps:$4 sm:$0xff]  }
  0x1b   : > { %652 = vmatprep.subr.bf16.mxu0 %v1610_v1  ;;  %1486 = vmatprep.subr.bf16.mxu1 %v1610_v1  ;;  %v1739_v48 = vld [vmem:[%s1806_s2] ss:$0 sm:$0xff] }
  0x1e   : > { %653 = vmatpush1.bf16.msra.mxu0 %v1532_v5  ;;  %1496 = vmatpush1.bf16.msra.mxu1 %v1532_v5 }
  0x1f   : > { %654 = vmatprep.subr.bf16.mxu0 %v1610_v1  ;;  %1487 = vmatprep.subr.bf16.mxu1 %v1610_v1 }
  0x22   : > { %655 = vmatpush1.bf16.msra.mxu0 %v1533_v8  ;;  %1497 = vmatpush1.bf16.msra.mxu1 %v1533_v8 }
  0x23   : > { %656 = vmatprep.subr.bf16.mxu0 %v1610_v1  ;;  %1488 = vmatprep.subr.bf16.mxu1 %v1610_v1 }
  0x26   : > { %657 = vmatpush1.bf16.msra.mxu0 %v1534_v9  ;;  %1498 = vmatpush1.bf16.msra.mxu1 %v1534_v9 }
  0x27   : > { %658 = vmatprep.subr.bf16.mxu0 %v1610_v1  ;;  %1489 = vmatprep.subr.bf16.mxu1 %v1610_v1 }
  0x2a   : > { %659 = vmatpush1.bf16.msra.mxu0 %v1535_v12  ;;  %1499 = vmatpush1.bf16.msra.mxu1 %v1535_v12 }
  0x2b   : > { %672 = vmatprep.subr.bf16.mxu0 %v1610_v1  ;;  %1490 = vmatprep.subr.bf16.mxu1 %v1610_v1 }
  0x2e   : > { %673 = vmatpush2.bf16.msra.mxu0 %v642_v15  ;;  %1500 = vmatpush2.bf16.msra.mxu1 %v642_v15 }
  0x2f   : > { %674 = vmatprep.subr.bf16.mxu0 %v1610_v1  ;;  %1491 = vmatprep.subr.bf16.mxu1 %v1610_v1 }
  0x32   : > { %675 = vmatpush2.bf16.msra.mxu0 %v1537_v16  ;;  %1501 = vmatpush2.bf16.msra.mxu1 %v1537_v16 }
  0x35   : > { %677 = vmatmul.mubr.bf16.vlgmr.msra.gmra.mxu0 %v1538_v17  ;;  %741 = vmatmul.mubr.bf16.vlgmr.msra.gmra.mxu1 %v1541_v18 }
  0x36   : > { %1304 = vmatprep.mubr.msk.bf16.mxu0 %vm588_vm0, %v1544_v19  ;;  %1312 = vmatprep.mubr.msk.bf16.mxu1 %vm588_vm0, %v1546_v20 }
  0x3d   : > { %685 = vmatmul.mubr.bf16.gmra.mxu0 %v1548_v21  ;;  %749 = vmatmul.mubr.bf16.gmra.mxu1 %v1549_v22 }
  0x3e   : > { %1305 = vmatprep.mubr.msk.bf16.mxu0 %vm588_vm0, %v1550_v23  ;;  %1313 = vmatprep.mubr.msk.bf16.mxu1 %vm588_vm0, %v1552_v24 }
  0x45   : > { %693 = vmatmul.mubr.bf16.gmra.mxu0 %v1554_v25  ;;  %757 = vmatmul.mubr.bf16.gmra.mxu1 %v1555_v26 }
  0x46   : > { %1306 = vmatprep.mubr.msk.bf16.mxu0 %vm588_vm0, %v1556_v27  ;;  %1314 = vmatprep.mubr.msk.bf16.mxu1 %vm588_vm0, %v1558_v28 }
  0x4d   : > { %701 = vmatmul.mubr.bf16.gmra.mxu0 %v1560_v29  ;;  %765 = vmatmul.mubr.bf16.gmra.mxu1 %v1561_v30 }
  0x4e   : > { %1307 = vmatprep.mubr.msk.bf16.mxu0 %vm588_vm0, %v1562_v31  ;;  %1315 = vmatprep.mubr.msk.bf16.mxu1 %vm588_vm0, %v1564_v32 }
  0x55   : > { %709 = vmatmul.mubr.bf16.gmra.mxu0 %v1566_v33  ;;  %773 = vmatmul.mubr.bf16.gmra.mxu1 %v1567_v34 }
  0x56   : > { %1308 = vmatprep.mubr.msk.bf16.mxu0 %vm588_vm0, %v1568_v35  ;;  %1316 = vmatprep.mubr.msk.bf16.mxu1 %vm588_vm0, %v1570_v36 }
  0x5d   : > { %717 = vmatmul.mubr.bf16.gmra.mxu0 %v1572_v37  ;;  %781 = vmatmul.mubr.bf16.gmra.mxu1 %v1573_v38 }
  0x5e   : > { %1309 = vmatprep.mubr.msk.bf16.mxu0 %vm588_vm0, %v1574_v39  ;;  %1317 = vmatprep.mubr.msk.bf16.mxu1 %vm588_vm0, %v1576_v40 }
  0x65   : > { %725 = vmatmul.mubr.bf16.gmra.mxu0 %v1578_v41  ;;  %789 = vmatmul.mubr.bf16.gmra.mxu1 %v1579_v42 }
  0x66   : > { %1310 = vmatprep.mubr.msk.bf16.mxu0 %vm588_vm0, %v1580_v43  ;;  %1318 = vmatprep.mubr.msk.bf16.mxu1 %vm588_vm0, %v1582_v44 }
  0x6d   : > { %733 = vmatmul.mubr.bf16.gmra.mxu0 %v1584_v45  ;;  %797 = vmatmul.mubr.bf16.gmra.mxu1 %v1585_v46 }
  0xf5   : > { %v678_v47 = vpop.f32.mrf.mxu0  ;;  %v742_v49 = vpop.f32.mrf.mxu1 }
  0xf6   : > { %v911_v52 = vadd.f32 %v1739_v48, %v678_v47  ;;  %v927_v53 = vadd.f32 %v1739_v48, %v742_v49 }
  0xf7   : > { %v680_v50 = vpop.f32.mrf.mxu0  ;;  %v744_v51 = vpop.f32.mrf.mxu1 }
  0xf8   : > { %v943_v60 = vmax.f32 %v911_v52, 0.0  ;;  %v959_v61 = vmax.f32 %v927_v53, 0.0 }
  0xf9   : > { %v681_v54 = vpop.f32.mrf.mxu0  ;;  %v745_v55 = vpop.f32.mrf.mxu1 }
  0xfa   : > { %v912_v56 = vadd.f32 %v1739_v48, %v681_v54  ;;  %v928_v57 = vadd.f32 %v1739_v48, %v745_v55 }
  0xfb   : > { %v683_v58 = vpop.f32.mrf.mxu0  ;;  %v747_v59 = vpop.f32.mrf.mxu1 }
  0xfc   : > { %v944_v62 = vmax.f32 %v912_v56, 0.0  ;;  %v960_v63 = vmax.f32 %v928_v57, 0.0 }
  0xfd   : > { %v686_v0 = vpop.f32.mrf.mxu0  ;;  %v750_v1 = vpop.f32.mrf.mxu1 }
  0xfe   : > { %v1390_v2 = vpack.c.bf16 %v944_v62, %v943_v60  ;;  %v1430_v3 = vpack.c.bf16 %v960_v63, %v959_v61  ;;  %v913_v6 = vadd.f32 %v1739_v48, %v686_v0  ;;  %v929_v7 = vadd.f32 %v1739_v48, %v750_v1 }
  0xff   : > { %v688_v4 = vpop.f32.mrf.mxu0  ;;  %v752_v5 = vpop.f32.mrf.mxu1 }
 0x100   : > { %1391 = vst [vmem:[%s1749_s23] sm:$0xff] %v1390_v2   ;;  %1474 = vst [vmem:[%s1749_s23 + $0x40] sm:$0xff] %v1430_v3   ;;  %v945_v14 = vmax.f32 %v913_v6, 0.0  ;;  %v961_v15 = vmax.f32 %v929_v7, 0.0 }
 0x101   : > { %v689_v8 = vpop.f32.mrf.mxu0  ;;  %v753_v9 = vpop.f32.mrf.mxu1 }
 0x102   : > { %v914_v10 = vadd.f32 %v1739_v48, %v689_v8  ;;  %v930_v11 = vadd.f32 %v1739_v48, %v753_v9 }
 0x103   : > { %v691_v12 = vpop.f32.mrf.mxu0  ;;  %v755_v13 = vpop.f32.mrf.mxu1 }
 0x104   : > { %v946_v16 = vmax.f32 %v914_v10, 0.0  ;;  %v962_v17 = vmax.f32 %v930_v11, 0.0 }
 0x105   : > { %v694_v18 = vpop.f32.mrf.mxu0  ;;  %v758_v19 = vpop.f32.mrf.mxu1 }
 0x106   : > { %v1395_v20 = vpack.c.bf16 %v946_v16, %v945_v14  ;;  %v1435_v21 = vpack.c.bf16 %v962_v17, %v961_v15  ;;  %v915_v24 = vadd.f32 %v1739_v48, %v694_v18  ;;  %v931_v25 = vadd.f32 %v1739_v48, %v758_v19 }
 0x107   : > { %v696_v22 = vpop.f32.mrf.mxu0  ;;  %v760_v23 = vpop.f32.mrf.mxu1 }
 0x108   : > { %1467 = vst [vmem:[%s1749_s23 + $0x8] sm:$0xff] %v1395_v20   ;;  %1475 = vst [vmem:[%s1749_s23 + $0x48] sm:$0xff] %v1435_v21   ;;  %v947_v32 = vmax.f32 %v915_v24, 0.0  ;;  %v963_v33 = vmax.f32 %v931_v25, 0.0 }
 0x109   : > { %v697_v26 = vpop.f32.mrf.mxu0  ;;  %v761_v27 = vpop.f32.mrf.mxu1 }
 0x10a   : > { %v916_v28 = vadd.f32 %v1739_v48, %v697_v26  ;;  %v932_v29 = vadd.f32 %v1739_v48, %v761_v27 }
 0x10b   : > { %v699_v30 = vpop.f32.mrf.mxu0  ;;  %v763_v31 = vpop.f32.mrf.mxu1 }
 0x10c   : > { %v948_v34 = vmax.f32 %v916_v28, 0.0  ;;  %v964_v35 = vmax.f32 %v932_v29, 0.0 }
 0x10d   : > { %v702_v36 = vpop.f32.mrf.mxu0  ;;  %v766_v37 = vpop.f32.mrf.mxu1 }
 0x10e   : > { %v1400_v38 = vpack.c.bf16 %v948_v34, %v947_v32  ;;  %v1440_v39 = vpack.c.bf16 %v964_v35, %v963_v33  ;;  %v917_v42 = vadd.f32 %v1739_v48, %v702_v36  ;;  %v933_v43 = vadd.f32 %v1739_v48, %v766_v37 }
 0x10f   : > { %v704_v40 = vpop.f32.mrf.mxu0  ;;  %v768_v41 = vpop.f32.mrf.mxu1 }
 0x110   : > { %1468 = vst [vmem:[%s1749_s23 + $0x10] sm:$0xff] %v1400_v38   ;;  %1476 = vst [vmem:[%s1749_s23 + $0x50] sm:$0xff] %v1440_v39   ;;  %v949_v51 = vmax.f32 %v917_v42, 0.0  ;;  %v965_v52 = vmax.f32 %v933_v43, 0.0 }
 0x111   : > { %v705_v44 = vpop.f32.mrf.mxu0  ;;  %v769_v45 = vpop.f32.mrf.mxu1 }
 0x112   : > { %v918_v46 = vadd.f32 %v1739_v48, %v705_v44  ;;  %v934_v47 = vadd.f32 %v1739_v48, %v769_v45 }
 0x113   : > { %v707_v49 = vpop.f32.mrf.mxu0  ;;  %v771_v50 = vpop.f32.mrf.mxu1 }
 0x114   : > { %v950_v53 = vmax.f32 %v918_v46, 0.0  ;;  %v966_v54 = vmax.f32 %v934_v47, 0.0 }
 0x115   : > { %v710_v55 = vpop.f32.mrf.mxu0  ;;  %v774_v56 = vpop.f32.mrf.mxu1 }
 0x116   : > { %v1405_v57 = vpack.c.bf16 %v950_v53, %v949_v51  ;;  %v1445_v58 = vpack.c.bf16 %v966_v54, %v965_v52  ;;  %v919_v61 = vadd.f32 %v1739_v48, %v710_v55  ;;  %v935_v62 = vadd.f32 %v1739_v48, %v774_v56 }
 0x117   : > { %v712_v59 = vpop.f32.mrf.mxu0  ;;  %v776_v60 = vpop.f32.mrf.mxu1 }
 0x118   : > { %1469 = vst [vmem:[%s1749_s23 + $0x18] sm:$0xff] %v1405_v57   ;;  %1477 = vst [vmem:[%s1749_s23 + $0x58] sm:$0xff] %v1445_v58   ;;  %v951_v5 = vmax.f32 %v919_v61, 0.0  ;;  %v967_v6 = vmax.f32 %v935_v62, 0.0 }
 0x119   : > { %v713_v63 = vpop.f32.mrf.mxu0  ;;  %v777_v0 = vpop.f32.mrf.mxu1 }
 0x11a   : > { %v920_v1 = vadd.f32 %v1739_v48, %v713_v63  ;;  %v936_v2 = vadd.f32 %v1739_v48, %v777_v0 }
 0x11b   : > { %v715_v3 = vpop.f32.mrf.mxu0  ;;  %v779_v4 = vpop.f32.mrf.mxu1 }
 0x11c   : > { %v952_v7 = vmax.f32 %v920_v1, 0.0  ;;  %v968_v8 = vmax.f32 %v936_v2, 0.0 }
 0x11d   : > { %v718_v9 = vpop.f32.mrf.mxu0  ;;  %v782_v10 = vpop.f32.mrf.mxu1 }
 0x11e   : > { %v1410_v11 = vpack.c.bf16 %v952_v7, %v951_v5  ;;  %v1450_v12 = vpack.c.bf16 %v968_v8, %v967_v6  ;;  %v921_v15 = vadd.f32 %v1739_v48, %v718_v9  ;;  %v937_v16 = vadd.f32 %v1739_v48, %v782_v10 }
 0x11f   : > { %v720_v13 = vpop.f32.mrf.mxu0  ;;  %v784_v14 = vpop.f32.mrf.mxu1 }
 0x120   : > { %1470 = vst [vmem:[%s1749_s23 + $0x20] sm:$0xff] %v1410_v11   ;;  %1478 = vst [vmem:[%s1749_s23 + $0x60] sm:$0xff] %v1450_v12   ;;  %v953_v23 = vmax.f32 %v921_v15, 0.0  ;;  %v969_v24 = vmax.f32 %v937_v16, 0.0 }
 0x121   : > { %v721_v17 = vpop.f32.mrf.mxu0  ;;  %v785_v18 = vpop.f32.mrf.mxu1 }
 0x122   : > { %v922_v19 = vadd.f32 %v1739_v48, %v721_v17  ;;  %v938_v20 = vadd.f32 %v1739_v48, %v785_v18 }
 0x123   : > { %v723_v21 = vpop.f32.mrf.mxu0  ;;  %v787_v22 = vpop.f32.mrf.mxu1 }
 0x124   : > { %v954_v25 = vmax.f32 %v922_v19, 0.0  ;;  %v970_v26 = vmax.f32 %v938_v20, 0.0 }
 0x125   : > { %v726_v27 = vpop.f32.mrf.mxu0  ;;  %v790_v28 = vpop.f32.mrf.mxu1 }
 0x126   : > { %v1415_v29 = vpack.c.bf16 %v954_v25, %v953_v23  ;;  %v1455_v30 = vpack.c.bf16 %v970_v26, %v969_v24  ;;  %v923_v33 = vadd.f32 %v1739_v48, %v726_v27  ;;  %v939_v34 = vadd.f32 %v1739_v48, %v790_v28 }
 0x127   : > { %v728_v31 = vpop.f32.mrf.mxu0  ;;  %v792_v32 = vpop.f32.mrf.mxu1 }
 0x128   : > { %1471 = vst [vmem:[%s1749_s23 + $0x28] sm:$0xff] %v1415_v29   ;;  %1479 = vst [vmem:[%s1749_s23 + $0x68] sm:$0xff] %v1455_v30   ;;  %v955_v41 = vmax.f32 %v923_v33, 0.0  ;;  %v971_v42 = vmax.f32 %v939_v34, 0.0 }
 0x129   : > { %v729_v35 = vpop.f32.mrf.mxu0  ;;  %v793_v36 = vpop.f32.mrf.mxu1 }
 0x12a   : > { %v924_v37 = vadd.f32 %v1739_v48, %v729_v35  ;;  %v940_v38 = vadd.f32 %v1739_v48, %v793_v36 }
 0x12b   : > { %v731_v39 = vpop.f32.mrf.mxu0  ;;  %v795_v40 = vpop.f32.mrf.mxu1 }
 0x12c   : > { %v956_v43 = vmax.f32 %v924_v37, 0.0  ;;  %v972_v44 = vmax.f32 %v940_v38, 0.0 }
 0x12d   : > { %v734_v45 = vpop.f32.mrf.mxu0  ;;  %v798_v46 = vpop.f32.mrf.mxu1 }
 0x12e   : > { %v1420_v47 = vpack.c.bf16 %v956_v43, %v955_v41  ;;  %v1460_v49 = vpack.c.bf16 %v972_v44, %v971_v42  ;;  %v925_v52 = vadd.f32 %v1739_v48, %v734_v45  ;;  %v941_v53 = vadd.f32 %v1739_v48, %v798_v46 }
 0x12f   : > { %v736_v50 = vpop.f32.mrf.mxu0  ;;  %v800_v51 = vpop.f32.mrf.mxu1 }
 0x130   : > { %1472 = vst [vmem:[%s1749_s23 + $0x30] sm:$0xff] %v1420_v47   ;;  %1480 = vst [vmem:[%s1749_s23 + $0x70] sm:$0xff] %v1460_v49   ;;  %v957_v60 = vmax.f32 %v925_v52, 0.0  ;;  %v973_v61 = vmax.f32 %v941_v53, 0.0 }
 0x131   : > { %v737_v54 = vpop.f32.mrf.mxu0  ;;  %v801_v55 = vpop.f32.mrf.mxu1 }
 0x132   : > { %v926_v56 = vadd.f32 %v1739_v48, %v737_v54  ;;  %v942_v57 = vadd.f32 %v1739_v48, %v801_v55 }
 0x133   : > { %v739_v58 = vpop.f32.mrf.mxu0  ;;  %v803_v59 = vpop.f32.mrf.mxu1 }
 0x134   : > { %v958_v62 = vmax.f32 %v926_v56, 0.0  ;;  %v974_v63 = vmax.f32 %v942_v57, 0.0 }
 0x136   : > { %v1425_v0 = vpack.c.bf16 %v958_v62, %v957_v60  ;;  %v1465_v1 = vpack.c.bf16 %v974_v63, %v973_v61 }
 0x138   : > { %1473 = vst [vmem:[%s1749_s23 + $0x38] sm:$0xff] %v1425_v0   ;;  %1481 = vst [vmem:[%s1749_s23 + $0x78] sm:$0xff] %v1465_v1  }
 0x139 PF: > { %s13_s14 = sadd.s32 1, %s1608_s14   ;;  %s1808_s12 = smov %s1604_s13 }
 0x13a   : > { %p10_p5 = scmp.ge.s32.totalorder %s13_s14, 18   ;;  %s1809_s13 = smov %s1811_s15 }
 0x13c   :  { %12 = sbr.rel (!%p10_p5) target bundleno = 2 (0x2), region = 76 }

</bundles_post_ra>
